<compile_context>
chip_gen: v5e
topology: v5e:2x2
jax: 0.10.0
libtpu: 0.0.40
codegen_flags: <defaults>
</compile_context>

<pallas_src>
import jax
import jax.numpy as jnp
from jax.experimental import pallas as pl
from jax.experimental.pallas import tpu as pltpu


# ----------------------------------------------------------------------------- shared backbone
def _backbone(x, w1_ref, w23_ref, tail_ref):
    """x (rows, F) f32 -> h (rows, 128) f32 (layer-3 output, cols 64..127 == 0)."""
    f32 = jnp.float32
    cdt = w1_ref.dtype                      # MXU compute dtype (bf16)

    # linear_block1: Linear(F -> 128) + ReLU (bf16 MXU operands, f32 accumulate)
    h = jnp.dot(x.astype(cdt), w1_ref[...], preferred_element_type=f32)
    h = jnp.maximum(h + tail_ref[0:1, :], 0.0)
    # linear_block2: Linear(128 -> 128) + ReLU
    h = jnp.dot(h.astype(cdt), w23_ref[0], preferred_element_type=f32)
    h = jnp.maximum(h + tail_ref[1:2, :], 0.0)
    # linear_block3: Linear(128 -> 64) + ReLU, zero-padded 64 -> 128 lanes so the
    # activation stays lane-dense (padded columns are exactly 0 after ReLU).
    h = jnp.dot(h.astype(cdt), w23_ref[1], preferred_element_type=f32)
    h = jnp.maximum(h + tail_ref[2:3, :], 0.0)
    return h


# ----------------------------------------------------------------------------- kernels
def _merge_small_kernel(a_ref, b_ref, w1_ref, w23_ref, tail_ref, out_ref):
    """Gridless small-batch kernel: output is a plain (B, 1) column."""
    h = _backbone(a_ref[...] - b_ref[...], w1_ref, w23_ref, tail_ref)      # (B,128)
    # Linear(64 -> 1): VPU multiply + lane reduce (B is tiny here), + b4, sigmoid.
    logit = jnp.sum(h * tail_ref[3:4, :], axis=-1, keepdims=True)          # (B,1)
    logit = logit + tail_ref[4:5, 0:1]
    out_ref[...] = jax.nn.sigmoid(logit).astype(out_ref.dtype)


def _merge_tiled_kernel(a_ref, b_ref, w1_ref, w23_ref, w4rep_ref, tail_ref,
                        diag_ref, rows_ref, out_ref):
    """Batch-tiled kernel: compact lane-dense output (tb/128, 128)."""
    f32 = jnp.float32
    cdt = w1_ref.dtype
    h = _backbone(a_ref[...] - b_ref[...], w1_ref, w23_ref, tail_ref)      # (tb,128)

    # linear_block_r_last on the MXU: w4 replicated across all 128 output
    # columns -> every column of `p` holds the (bias-less) logit of its row.
    p = jnp.dot(h.astype(cdt), w4rep_ref[...], preferred_element_type=f32)  # (tb,128)

    # Compact relayout with 2-D ops only:
    #   keep just p[r, r % 128] (diag selector).  The finiteness check also
    #   zeroes garbage rows coming from the masked partial last block, so they
    #   cannot leak into valid rows through the selection matmul below.
    keep = jnp.logical_and(diag_ref[...] > 0.5, jnp.abs(p) < 3.0e38)
    pm = jnp.where(keep, p, 0.0)                                            # (tb,128)
    #   then sum each group of 128 consecutive rows (row-group selector @ pm):
    #   exactly one nonzero term per output -> logit[i, c] = logit of row i*128+c.
    logit = jnp.dot(rows_ref[...], pm, preferred_element_type=f32)          # (tb/128,128)
    logit = logit + tail_ref[4:5, :]                                        # + b4 (lane-broadcast row)
    out_ref[...] = jax.nn.sigmoid(logit).astype(out_ref.dtype)


# ----------------------------------------------------------------------------- wrapper
def _round_up(x, m):
    return ((x + m - 1) // m) * m


def merge_model_pallas(x0, x1, params, *, tile_b=4096, gridless_max=1024):
    """Fused MergeModel forward.

    x0, x1 : (B, in_features) float32
    params : dict from pack_params(): w1 (F,128) bf16, w23 (2,128,128) bf16,
             w4rep (128,128) bf16, tail (8,128) f32.
    Returns (B, 1) float32.
    """
    B, F = x0.shape
    w1, w23, w4rep, tail = params["w1"], params["w23"], params["w4rep"], params["tail"]

    # ---- small batch: single un-pipelined invocation, everything in VMEM ----
    # (on v5e/v6e — 1 TensorCore — gridless_max can be raised to ~4-8K to skip
    #  pipeline overhead entirely; keep it modest so v7x's 2 cores stay busy).
    if B <= gridless_max or B <= 1024:
        vmem = pl.BlockSpec(memory_space=pltpu.MemorySpace.VMEM)
        return pl.pallas_call(
            _merge_small_kernel,
            out_shape=jax.ShapeDtypeStruct((B, 1), jnp.float32),
            in_specs=[vmem, vmem, vmem, vmem, vmem],
            out_specs=vmem,
        )(x0, x1, w1, w23, tail)

    # ---- batch-tiled path: pipeline over batch, weights resident, no pad ----
    # tile is a multiple of 1024 so the compact output block (tb/128, 128)
    # satisfies the (8,128) tiling rule; keep >= 2 grid steps for v7x megacore.
    tb_cap = max(1024, (tile_b // 1024) * 1024)
    tb = min(tb_cap, _round_up(-(-B // 2), 1024))
    grid = -(-B // tb)
    ni = tb // 128                          # compact output rows per tile
    rows_out = -(-B // 128)                 # total compact output rows

    # Selector constants (plain JAX, outside the kernel; resident in VMEM).
    r = jnp.arange(tb, dtype=jnp.int32)
    sel_diag = (r[:, None] % 128 ==
                jnp.arange(128, dtype=jnp.int32)[None, :]).astype(jnp.float32)   # (tb,128)
    sel_rows = (r[None, :] // 128 ==
                jnp.arange(ni, dtype=jnp.int32)[:, None]).astype(jnp.float32)    # (ni,tb)

    out = pl.pallas_call(
        _merge_tiled_kernel,
        out_shape=jax.ShapeDtypeStruct((rows_out, 128), jnp.float32),
        grid=(grid,),
        in_specs=[
            pl.BlockSpec((tb, F), lambda i: (i, 0)),          # x0 tile
            pl.BlockSpec((tb, F), lambda i: (i, 0)),          # x1 tile
            pl.BlockSpec(w1.shape, lambda i: (0, 0)),         # resident weights
            pl.BlockSpec(w23.shape, lambda i: (0, 0, 0)),     # resident weights
            pl.BlockSpec(w4rep.shape, lambda i: (0, 0)),      # resident weights
            pl.BlockSpec(tail.shape, lambda i: (0, 0)),       # resident biases
            pl.BlockSpec(sel_diag.shape, lambda i: (0, 0)),   # resident selector
            pl.BlockSpec(sel_rows.shape, lambda i: (0, 0)),   # resident selector
        ],
        out_specs=pl.BlockSpec((ni, 128), lambda i: (i, 0)),
        compiler_params=pltpu.CompilerParams(
            # batch tiles are independent -> shard across the 2 TCs on v7x
            dimension_semantics=("parallel",),
            # tb=4096 needs ~20 MiB live; > v5e's 16 MiB scoped default, well
            # under v7x's 64 MiB physical.
            vmem_limit_bytes=48 * 1024 * 1024,
        ),
    )(x0, x1, w1, w23, w4rep, tail, sel_diag, sel_rows)

    # Free metadata reshape + tiny slice: compact (rows,128) row-major == batch order.
    return out.reshape(-1, 1)[:B]


# ----------------------------------------------------------------------------- params
def init_raw_params(key, in_features):
    """Deterministic synthetic init, PyTorch nn.Linear-style.

    Weights are stored already transposed as [in, out]; biases as [out]."""
    ks = jax.random.split(key, 8)

    def linear(kw, kb, fin, fout):
        bound = 1.0 / jnp.sqrt(jnp.float32(fin))
        w = jax.random.uniform(kw, (fin, fout), jnp.float32, -bound, bound)
        b = jax.random.uniform(kb, (fout,), jnp.float32, -bound, bound)
        return w, b

    w1, b1 = linear(ks[0], ks[1], in_features, 128)
    w2, b2 = linear(ks[2], ks[3], 128, 128)
    w3, b3 = linear(ks[4], ks[5], 128, 64)
    w4, b4 = linear(ks[6], ks[7], 64, 1)
    return (w1, b1, w2, b2, w3, b3, w4, b4)


def pack_params(w1, b1, w2, b2, w3, b3, w4, b4, compute_dtype=jnp.bfloat16):
    """Pack 8 tensors into 4 dense TPU-friendly operands.

    - layer-3 weight/bias zero-padded 64 -> 128 (lane-dense activations)
    - w4 packed two ways: as a 128-wide row (for the small-batch VPU reduce) and
      replicated across 128 output columns (for the tiled MXU final layer)
    - all biases + w4 row + lane-broadcast b4 packed into one (8, 128) f32 'tail'
    - matmul weights stored in `compute_dtype` (bf16 by default)
    """
    f32 = jnp.float32
    w3p = jnp.zeros((128, 128), f32).at[:, :64].set(w3.astype(f32))
    b3p = jnp.zeros((128,), f32).at[:64].set(b3.astype(f32))
    w4r = jnp.zeros((128,), f32).at[:64].set(w4.astype(f32).reshape(64))
    b4s = b4.astype(f32).reshape(())
    tail = jnp.stack([
        b1.astype(f32),                    # row 0: b1
        b2.astype(f32),                    # row 1: b2
        b3p,                               # row 2: b3 (padded)
        w4r,                               # row 3: w4 row (padded)
        jnp.full((128,), b4s, f32),        # row 4: b4 broadcast across lanes
        jnp.zeros((128,), f32),
        jnp.zeros((128,), f32),
        jnp.zeros((128,), f32),
    ])                                      # (8, 128) f32
    w23 = jnp.stack([w2.astype(f32), w3p]).astype(compute_dtype)   # (2, 128, 128)
    w4rep = jnp.zeros((128, 128), f32).at[:64, :].set(
        jnp.broadcast_to(w4.astype(f32).reshape(64, 1), (64, 128))
    ).astype(compute_dtype)                                        # (128, 128)
    return dict(w1=w1.astype(compute_dtype), w23=w23, w4rep=w4rep, tail=tail)


# ----------------------------------------------------------------------------- reference
def merge_model_ref(x0, x1, raw):
    """Pure-JAX f32 reference (mirrors the PyTorch forward)."""
    w1, b1, w2, b2, w3, b3, w4, b4 = raw
    x = x0 - x1
    x = jnp.maximum(x @ w1 + b1, 0.0)
    x = jnp.maximum(x @ w2 + b2, 0.0)
    x = jnp.maximum(x @ w3 + b3, 0.0)
    r = x @ w4 + b4
    return jax.nn.sigmoid(r)


# ----------------------------------------------------------------------------- main
if __name__ == "__main__":
    key = jax.random.PRNGKey(0)
    k0, k1, kp, k2, k3 = jax.random.split(key, 5)

    in_features = 32
    raw = init_raw_params(kp, in_features)
    params = pack_params(*raw)            # bf16 matmul weights, f32 tail

    # --- small batch: gridless single-invocation path, (B,1) output ---
    b_small = 8
    x0 = jax.random.normal(k0, (b_small, in_features), jnp.float32)
    x1 = jax.random.normal(k1, (b_small, in_features), jnp.float32)
    out_s = jax.block_until_ready(merge_model_pallas(x0, x1, params))
    ref_s = merge_model_ref(x0, x1, raw)
    assert out_s.shape == (b_small, 1)
    assert jnp.allclose(out_s, ref_s, atol=2e-2, rtol=2e-2), "small-batch mismatch"

    # --- larger ragged batch: tiled path (no pad, partial last block, compact out) ---
    b_big = 1500
    y0 = jax.random.normal(k2, (b_big, in_features), jnp.float32)
    y1 = jax.random.normal(k3, (b_big, in_features), jnp.float32)
    out_b = jax.block_until_ready(merge_model_pallas(y0, y1, params))
    ref_b = merge_model_ref(y0, y1, raw)
    assert out_b.shape == (b_big, 1)
    assert jnp.allclose(out_b, ref_b, atol=2e-2, rtol=2e-2), "tiled-batch mismatch"

    print("KERNEL_OK")
</pallas_src>

<mosaic_0001>
module attributes {stable_mosaic.version = 11 : i64} {
  func.func @_merge_small_kernel(%arg0: memref<8x32xf32, #tpu.memory_space<vmem>>, %arg1: memref<8x32xf32, #tpu.memory_space<vmem>>, %arg2: memref<32x128xbf16, #tpu.memory_space<vmem>>, %arg3: memref<2x128x128xbf16, #tpu.memory_space<vmem>>, %arg4: memref<8x128xf32, #tpu.memory_space<vmem>>, %arg5: memref<8x1xf32, #tpu.memory_space<vmem>>) attributes {dimension_semantics = [], scalar_prefetch = 0 : i64, scratch_operands = 0 : i64, tpu.core_type = #tpu.core_type<tc>} {
    %c0 = arith.constant 0 : index
    %c0_0 = arith.constant 0 : index
    %0 = vector.load %arg0[%c0, %c0_0] : memref<8x32xf32, #tpu.memory_space<vmem>>, vector<8x32xf32>
    %c0_1 = arith.constant 0 : index
    %c0_2 = arith.constant 0 : index
    %1 = vector.load %arg1[%c0_1, %c0_2] : memref<8x32xf32, #tpu.memory_space<vmem>>, vector<8x32xf32>
    %2 = arith.subf %0, %1 : vector<8x32xf32>
    %3 = arith.truncf %2 : vector<8x32xf32> to vector<8x32xbf16>
    %c0_3 = arith.constant 0 : index
    %c0_4 = arith.constant 0 : index
    %4 = vector.load %arg2[%c0_3, %c0_4] : memref<32x128xbf16, #tpu.memory_space<vmem>>, vector<32x128xbf16>
    %cst = arith.constant dense<0.000000e+00> : vector<8x128xf32>
    %5 = tpu.matmul %3, %4, %cst {dimension_numbers = #tpu.dot_dimension_numbers<[1], [0], [0], [1], [0, 0, 1, 1], [], []>} : vector<8x32xbf16>, vector<32x128xbf16>, vector<8x128xf32> -> vector<8x128xf32>
    %c0_5 = arith.constant 0 : index
    %c0_6 = arith.constant 0 : index
    %6 = vector.load %arg4[%c0_5, %c0_6] : memref<8x128xf32, #tpu.memory_space<vmem>>, vector<1x128xf32>
    %7 = vector.broadcast %6 : vector<1x128xf32> to vector<8x128xf32>
    %8 = arith.addf %5, %7 : vector<8x128xf32>
    %cst_7 = arith.constant 0.000000e+00 : f32
    %9 = vector.broadcast %cst_7 : f32 to vector<8x128xf32>
    %10 = arith.maximumf %8, %9 : vector<8x128xf32>
    %11 = arith.truncf %10 : vector<8x128xf32> to vector<8x128xbf16>
    %c0_8 = arith.constant 0 : index
    %c0_9 = arith.constant 0 : index
    %c0_10 = arith.constant 0 : index
    %12 = vector.load %arg3[%c0_8, %c0_9, %c0_10] : memref<2x128x128xbf16, #tpu.memory_space<vmem>>, vector<1x128x128xbf16>
    %13 = vector.shape_cast %12 : vector<1x128x128xbf16> to vector<128x128xbf16>
    %cst_11 = arith.constant dense<0.000000e+00> : vector<8x128xf32>
    %14 = tpu.matmul %11, %13, %cst_11 {dimension_numbers = #tpu.dot_dimension_numbers<[1], [0], [0], [1], [0, 0, 1, 1], [], []>} : vector<8x128xbf16>, vector<128x128xbf16>, vector<8x128xf32> -> vector<8x128xf32>
    %c1 = arith.constant 1 : index
    %c0_12 = arith.constant 0 : index
    %15 = vector.load %arg4[%c1, %c0_12] : memref<8x128xf32, #tpu.memory_space<vmem>>, vector<1x128xf32>
    %16 = vector.broadcast %15 : vector<1x128xf32> to vector<8x128xf32>
    %17 = arith.addf %14, %16 : vector<8x128xf32>
    %cst_13 = arith.constant 0.000000e+00 : f32
    %18 = vector.broadcast %cst_13 : f32 to vector<8x128xf32>
    %19 = arith.maximumf %17, %18 : vector<8x128xf32>
    %20 = arith.truncf %19 : vector<8x128xf32> to vector<8x128xbf16>
    %c1_14 = arith.constant 1 : index
    %c0_15 = arith.constant 0 : index
    %c0_16 = arith.constant 0 : index
    %21 = vector.load %arg3[%c1_14, %c0_15, %c0_16] : memref<2x128x128xbf16, #tpu.memory_space<vmem>>, vector<1x128x128xbf16>
    %22 = vector.shape_cast %21 : vector<1x128x128xbf16> to vector<128x128xbf16>
    %cst_17 = arith.constant dense<0.000000e+00> : vector<8x128xf32>
    %23 = tpu.matmul %20, %22, %cst_17 {dimension_numbers = #tpu.dot_dimension_numbers<[1], [0], [0], [1], [0, 0, 1, 1], [], []>} : vector<8x128xbf16>, vector<128x128xbf16>, vector<8x128xf32> -> vector<8x128xf32>
    %c2 = arith.constant 2 : index
    %c0_18 = arith.constant 0 : index
    %24 = vector.load %arg4[%c2, %c0_18] : memref<8x128xf32, #tpu.memory_space<vmem>>, vector<1x128xf32>
    %25 = vector.broadcast %24 : vector<1x128xf32> to vector<8x128xf32>
    %26 = arith.addf %23, %25 : vector<8x128xf32>
    %cst_19 = arith.constant 0.000000e+00 : f32
    %27 = vector.broadcast %cst_19 : f32 to vector<8x128xf32>
    %28 = arith.maximumf %26, %27 : vector<8x128xf32>
    %c3 = arith.constant 3 : index
    %c0_20 = arith.constant 0 : index
    %29 = vector.load %arg4[%c3, %c0_20] : memref<8x128xf32, #tpu.memory_space<vmem>>, vector<1x128xf32>
    %30 = vector.broadcast %29 : vector<1x128xf32> to vector<8x128xf32>
    %31 = arith.mulf %28, %30 : vector<8x128xf32>
    %cst_21 = arith.constant dense<0.000000e+00> : vector<8xf32>
    %32 = vector.multi_reduction <add>, %31, %cst_21 [1] : vector<8x128xf32> to vector<8xf32>
    %33 = vector.shape_cast %32 : vector<8xf32> to vector<8x1xf32>
    %c4 = arith.constant 4 : index
    %c0_22 = arith.constant 0 : index
    %34 = vector.load %arg4[%c4, %c0_22] : memref<8x128xf32, #tpu.memory_space<vmem>>, vector<1x1xf32>
    %35 = vector.broadcast %34 : vector<1x1xf32> to vector<8x1xf32>
    %36 = arith.addf %33, %35 : vector<8x1xf32>
    %37 = arith.negf %36 : vector<8x1xf32>
    %38 = math.exp %37 : vector<8x1xf32>
    %cst_23 = arith.constant 1.000000e+00 : f32
    %39 = vector.broadcast %cst_23 : f32 to vector<8x1xf32>
    %40 = arith.addf %39, %38 : vector<8x1xf32>
    %41 = arith.divf %39, %40 : vector<8x1xf32>
    %c0_24 = arith.constant 0 : index
    %c0_25 = arith.constant 0 : index
    %42 = vector.load %arg5[%c0_24, %c0_25] : memref<8x1xf32, #tpu.memory_space<vmem>>, vector<8x1xf32>
    tpu.vector_store %arg5[%c0_24, %c0_25], %41 {strides = array<i32>} : memref<8x1xf32, #tpu.memory_space<vmem>>, vector<8x1xf32>,
    return
  }
}

</mosaic_0001>

<bundles_post_ra>
// kernel: tpu_custom_call.1
= control target key start
LH: loop header
LB: loop body
LE: loop exit
PB: predicated region body
PF: predicated region fallthrough
CT: control target
= control target key end

     0   :  { %10 = vsyncpa [#allocation3], 0  ;;  %s621_s0 = inlined_call_operand.hbm [shape: f32[8,32], index: 0, kind: input, shape index: {}]   ;;  %s622_s1 = inlined_call_operand.hbm [shape: f32[8,32], index: 1, kind: input, shape index: {}]   ;;  %s623_s2 = inlined_call_operand.hbm [shape: bf16[32,128], index: 2, kind: input, shape index: {}]   ;;  %s624_s3 = inlined_call_operand.hbm [shape: bf16[2,128,128], index: 3, kind: input, shape index: {}]   ;;  %s625_s4 = inlined_call_operand.hbm [shape: f32[8,128], index: 4, kind: input, shape index: {}]   ;;  %s626_s5 = inlined_call_operand.vmem [shape: f32[8,1], index: 5, kind: output, shape index: {}]  }
   0x1   :  { %11 = vsyncpa [#allocation5], 0  ;;  %s29_s20 = sshll.u32 %s622_s1, 4  ;;  %s30_s20 = int_to_ptr.hbm [resolvable:$true] %s29_s20 }
   0x2   :  { %12 = vsyncpa [#allocation8], 0  ;;  %s566_s21 = smov [#allocation4]   ;;  %s52_s25 = sshll.u32 %s624_s3, 4  ;;  %s53_s25 = int_to_ptr.hbm [resolvable:$true] %s52_s25 }
   0x3   :  { %s31_s22 = sshll.u32 %s566_s21, 4  ;;  %s567_s26 = smov [#allocation7]   ;;  %s32_s22 = int_to_ptr.vmem [resolvable:$true] %s31_s22 }
   0x4   :  { %34 = dma.hbm_to_vmem [thread:$0]  %s30_s20, 128, %s32_s22, [#allocation5]  }
   0x5   :  { %s54_s27 = sshll.u32 %s567_s26, 4  ;;  %s18_s30 = sshll.u32 %s621_s0, 4  ;;  %s55_s27 = int_to_ptr.vmem [resolvable:$true] %s54_s27  ;;  %s19_s30 = int_to_ptr.hbm [resolvable:$true] %s18_s30 }
   0x6   :  { %s568_s1 = smov 64   ;;  %s569_s6 = smov 4  }
   0x7   :  { %60 = dma.hbm_to_vmem [thread:$0]  %s53_s25, 2048, %s55_s27, [#allocation8], %s568_s1, %s568_s1, %s569_s6  }
   0x8   :  { %s39_s9 = sshll.u32 %s623_s2, 4  ;;  %s570_s10 = smov [#allocation2]   ;;  %s40_s9 = int_to_ptr.hbm [resolvable:$true] %s39_s9 }
   0x9   :  { %s20_s11 = sshll.u32 %s570_s10, 4  ;;  %s571_s3 = smov [#allocation6]   ;;  %s21_s11 = int_to_ptr.vmem [resolvable:$true] %s20_s11 }
   0xa   :  { %23 = dma.hbm_to_vmem [thread:$0]  %s19_s30, 128, %s21_s11, [#allocation3]  }
   0xb   :  { %s41_s12 = sshll.u32 %s571_s3, 4  ;;  %s66_s0 = sshll.u32 %s625_s4, 4  ;;  %s42_s12 = int_to_ptr.vmem [resolvable:$true] %s41_s12  ;;  %s67_s0 = int_to_ptr.hbm [resolvable:$true] %s66_s0 }
   0xc   :  { %47 = dma.hbm_to_vmem [thread:$0]  %s40_s9, 256, %s42_s12, [#allocation5], %s568_s1, %s568_s1, %s569_s6  }
   0xd   :  { %s572_s15 = smov [#allocation9]  }
   0xe   :  { %s68_s16 = sshll.u32 %s572_s15, 4  ;;  %s69_s16 = int_to_ptr.vmem [resolvable:$true] %s68_s16 }
   0xf   :  { %71 = dma.hbm_to_vmem [thread:$0]  %s67_s0, 128, %s69_s16, [#allocation8]  }
  0x10   :  { %560 = dma.done.wait [#allocation3], 128  }
  0x11   :  { %561 = vsyncadd [#allocation3], 4294967168 }
  0x12   :  { %562 = dma.done.wait [#allocation5], 384  }
  0x13   :  { %563 = vsyncadd [#allocation5], 4294966912 }
  0x14   :  { %564 = dma.done.wait [#allocation8], 2176  }
  0x15   :  { %565 = vsyncadd [#allocation8], 4294965120  ;;  %v407_v0 = vld [vmem:[#allocation6 + $0x8] sm:$0xff]  ;;  %v93_v1 = vld [vmem:[#allocation2] sm:$0xff]  ;;  %vm115_vm0 = vcmask 261120   ;;  %vm323_vm4 = vcmask 7168  }
  0x16   :  { %v94_v2 = vld [vmem:[#allocation4] sm:$0xff]  ;;  %v415_v3 = vld [vmem:[#allocation7 + $0x38] sm:$0xff]  ;;  %125 = vmatpush.bf16.msra.mxu0 %v407_v0  ;;  %v406_v4 = vld [vmem:[#allocation6] sm:$0xff] }
  0x17   :  { %v95_v5 = vsub.f32 %v93_v1, %v94_v2  ;;  %200 = vmatpush.bf16.msra.mxu1 %v415_v3  ;;  %v414_v6 = vld [vmem:[#allocation7 + $0x30] sm:$0xff]  ;;  %v413_v8 = vld [vmem:[#allocation7 + $0x28] sm:$0xff]  ;;  %v412_v9 = vld [vmem:[#allocation7 + $0x20] sm:$0xff] }
  0x18   :  { %v411_v10 = vld [vmem:[#allocation7 + $0x18] sm:$0xff]  ;;  %v410_v11 = vld [vmem:[#allocation7 + $0x10] sm:$0xff]  ;;  %v409_v12 = vld [vmem:[#allocation7 + $0x8] sm:$0xff] }
  0x19   :  { %v96_v7 = vpack.c.bf16 %v95_v5, %v95_v5  ;;  %v408_v13 = vld [vmem:[#allocation7] sm:$0xff]  ;;  %v423_v14 = vld [vmem:[#allocation7 + $0x78] sm:$0xff]  ;;  %v422_v15 = vld [vmem:[#allocation7 + $0x70] sm:$0xff] }
  0x1a   :  { %126 = vmatpush.bf16.msra.mxu0 %v406_v4  ;;  %282 = vmatpush.bf16.msra.mxu2 %v423_v14  ;;  %v421_v16 = vld [vmem:[#allocation7 + $0x68] sm:$0xff]  ;;  %v420_v17 = vld [vmem:[#allocation7 + $0x60] sm:$0xff]  ;;  %v419_v18 = vld [vmem:[#allocation7 + $0x58] sm:$0xff] }
  0x1b   :  { %201 = vmatpush.bf16.msra.mxu1 %v414_v6  ;;  %v418_v19 = vld [vmem:[#allocation7 + $0x50] sm:$0xff]  ;;  %v431_v20 = vld [vmem:[#allocation9] ss:$0 sm:$0xff]  ;;  %v417_v26 = vld [vmem:[#allocation7 + $0x48] sm:$0xff] }
  0x1c   :  { %v416_v27 = vld [vmem:[#allocation7 + $0x40] sm:$0xff] }
  0x1d   :  { %340 = vmatmul.msk.bf16.vlgmr.msra.gmra.mxu0 %vm115_vm0, %v96_v7  ;;  %v432_v28 = vld [vmem:[#allocation9 + $0x1] ss:$0 sm:$0xff]  ;;  %v433_v34 = vld [vmem:[#allocation9 + $0x2] ss:$0 sm:$0xff]  ;;  %v434_v37 = vld [vmem:[#allocation9 + $0x3] ss:$0 sm:$0xff] }
  0x1e   :  { %283 = vmatpush.bf16.msra.mxu2 %v422_v15  ;;  %v435_v41 = vld [vmem:[#allocation9 + $0x4] ss:$0 sm:$0xff] }
  0x1f   :  { %202 = vmatpush.bf16.msra.mxu1 %v413_v8 }
  0x22   :  { %284 = vmatpush.bf16.msra.mxu2 %v421_v16 }
  0x23   :  { %203 = vmatpush.bf16.msra.mxu1 %v412_v9 }
  0x26   :  { %285 = vmatpush.bf16.msra.mxu2 %v420_v17 }
  0x27   :  { %204 = vmatpush.bf16.msra.mxu1 %v411_v10 }
  0x2a   :  { %286 = vmatpush.bf16.msra.mxu2 %v419_v18 }
  0x2b   :  { %205 = vmatpush.bf16.msra.mxu1 %v410_v11 }
  0x2e   :  { %287 = vmatpush.bf16.msra.mxu2 %v418_v19 }
  0x2f   :  { %206 = vmatpush.bf16.msra.mxu1 %v409_v12 }
  0x32   :  { %288 = vmatpush.bf16.msra.mxu2 %v417_v26 }
  0x33   :  { %207 = vmatpush.bf16.msra.mxu1 %v408_v13 }
  0x36   :  { %289 = vmatpush.bf16.msra.mxu2 %v416_v27 }
  0x9a   :  { %v128_v21 = vpop.f32.mrf.mxu0 }
  0x9b   :  { %v129_v22 = vadd.f32 %v431_v20, %v128_v21 }
  0x9d   :  { %v132_v23 = vmax.f32 %v129_v22, 0.0 }
  0x9f   :  { %v133_v24 = vpack.c.bf16 %v132_v23, %v132_v23 }
  0xa1   :  { %208 = vmatmul.bf16.vlgmr.msra.gmra.mxu1 %v133_v24 }
  0xa2   :  { %v130_v25 = vpop.f32.mrf.mxu0 }
 0x11e   :  { %v209_v29 = vpop.f32.mrf.mxu1 }
 0x11f   :  { %v210_v30 = vadd.f32 %v432_v28, %v209_v29 }
 0x121   :  { %v213_v31 = vmax.f32 %v210_v30, 0.0 }
 0x123   :  { %v214_v32 = vpack.c.bf16 %v213_v31, %v213_v31 }
 0x125   :  { %290 = vmatmul.bf16.vlgmr.msra.gmra.mxu2 %v214_v32 }
 0x126   :  { %v211_v33 = vpop.f32.mrf.mxu1 }
 0x1a8   :  { %v291_v35 = vpop.f32.mrf.mxu2 }
 0x1a9   :  { %v292_v36 = vadd.f32 %v433_v34, %v291_v35 }
 0x1ab   :  { %v295_v38 = vmax.f32 %v292_v36, 0.0 }
 0x1ad   :  { %v298_v39 = vmul.f32 %v434_v37, %v295_v38 }
 0x1af   :  { %299 = vadd.xlane.f32.xlu0 %v298_v39 }
 0x1b0   :  { %v293_v40 = vpop.f32.mrf.mxu2 }
 0x222   :  { %v300_v42 = vpop.xlane.xlu0 %299 }
 0x223   :  { %v303_v43 = vadd.f32 %v435_v41, %v300_v42 }
 0x225   :  { %v405_v44 = vmul.f32 -1.442695, %v303_v43 }
 0x227   :  { %436 = vpow2.f32 %v405_v44 }
 0x22d   :  { %v437_v45 = vpop.eup %436 }
 0x22e   :  { %v307_v46 = vadd.f32 1.0, %v437_v45 }
 0x230   :  { %438 = vrcp.f32 %v307_v46  ;;  %v319_v50 = vand.u32 2147483648, %v307_v46  ;;  %v317_v52 = vand.u32 2147483647, %v307_v46  ;;  %vm313_vm2 = vweird.f32 %v307_v46 }
 0x232   :  { %v320_v54 = vor.u32 1.1754944e-38, %v319_v50  ;;  %vm318_vm5 = vcmp.eq.f32.partialorder %v317_v52, 8.507059e+37 }
 0x236   :  { %v439_v47 = vpop.eup %438 }
 0x237   :  { %v309_v48 = vmul.f32 %v439_v47, %v307_v46  ;;  %vm314_vm1 = vweird.f32 %v439_v47 }
 0x238   :  { %vm315_vm3 = vmor %vm313_vm2, %vm314_vm1 }
 0x239   :  { %v310_v49 = vsub.f32 1.0, %v309_v48 }
 0x23b   :  { %v311_v51 = vmul.f32 %v439_v47, %v310_v49 }
 0x23d   :  { %v312_v53 = vadd.f32 %v439_v47, %v311_v51 }
 0x23f   :  { %v316_v55 = vsel %vm315_vm3, %v439_v47, %v312_v53 }
 0x240   :  { %v321_v56 = vsel %vm318_vm5, %v320_v54, %v316_v55 }
 0x241   :  { %324 = vst.msk [vmem:[%s626_s5] sm:$0xff] %vm323_vm4, %v321_v56 }
 0x242   :  { %329 = vsyncpa [#allocation3], 1 }
 0x243   :  { %330 = vsyncpa [#allocation5], 1 }
 0x244   :  { %331 = vsyncpa [#allocation8], 1 }

</bundles_post_ra>
